<compile_context>
chip_gen: v6e
topology: v6e:2x2x1
jax: 0.10.0
libtpu: 0.0.40
codegen_flags: <defaults>
</compile_context>

<pallas_src>
import functools

import jax
import jax.numpy as jnp
from jax.experimental import pallas as pl
from jax.experimental.pallas import tpu as pltpu


def _round_up(x, m):
    return ((x + m - 1) // m) * m


def _vmem_limit_bytes():
    """Per-chip VMEM budget (85% of physical, capped at 112 MiB)."""
    try:
        cap = int(pltpu.get_tpu_info().vmem_capacity_bytes)
    except Exception:
        cap = 64 * 1024 * 1024  # conservative (v7x-sized) default
    return int(min(0.85 * cap, 112 * 1024 * 1024))


# ---------------------------------------------------------------------------
# Fused kernel: all GINConv layers + head.
#   per layer l, row-tile i:
#     h   = relu( BN2( relu( relu((Ahat@x) @ W1 + b1) @ W2' + b2' ) ) )
#           (BN1 folded into W2'/b2'; outer self.relu applied last)
#     out = softmax( relu(h @ fc1 + bf1) @ fc2 + bf2 )   over real targets
#   h is written into the ping-pong bf16 activation scratch for layer l+1.
# ---------------------------------------------------------------------------
def _gin_fused_kernel(ahat_ref, x0_ref, w1_ref, w2_ref, bias_ref,
                      fc1w_ref, fc1b_ref, fc2w_ref, fc2b_ref,
                      out_ref, act_ref, *, tm, n_pad, n_targets):
    l = pl.program_id(0)          # layer index      (sequential)
    i = pl.program_id(1)          # node-row tile    (sequential)

    # Prime the ping-pong activation buffer with the padded input features.
    @pl.when(jnp.logical_and(l == 0, i == 0))
    def _():
        act_ref[0] = x0_ref[...]

    row0 = pl.multiple_of(i * tm, tm)
    rd = l % 2                    # read parity
    wr = (l + 1) % 2              # write parity

    a_tile = ahat_ref[pl.ds(row0, tm), :]          # (tm, n_pad)   bf16
    x_full = act_ref[rd]                           # (n_pad, h_pad) bf16

    # GINConv sum aggregation, self term folded in: Ahat = A + (1 + eps) * I.
    agg = jnp.dot(a_tile, x_full, preferred_element_type=jnp.float32)

    # MLP: Linear1 -> ReLU -> [BN1 folded into W2/b2] -> Linear2 -> ReLU -> BN2
    b1 = bias_ref[0, 0:1, :]
    b2 = bias_ref[0, 1:2, :]
    s2 = bias_ref[0, 2:3, :]
    t2 = bias_ref[0, 3:4, :]

    h = jnp.dot(agg.astype(jnp.bfloat16), w1_ref[0],
                preferred_element_type=jnp.float32) + b1
    h = jnp.maximum(h, 0.0)
    h = jnp.dot(h.astype(jnp.bfloat16), w2_ref[0],
                preferred_element_type=jnp.float32) + b2
    h = jnp.maximum(h, 0.0)
    h = h * s2 + t2                  # BatchNorm1d #2 (eval, scale/shift)
    h = jnp.maximum(h, 0.0)          # outer self.relu in GIN.forward

    hb = h.astype(jnp.bfloat16)
    act_ref[wr, pl.ds(row0, tm), :] = hb           # activations for next layer

    # Head epilogue (dropout = identity in eval):
    #   relu(fc1(h)) -> fc2 -> masked softmax over the real targets.
    p = jnp.dot(hb, fc1w_ref[...], preferred_element_type=jnp.float32) \
        + fc1b_ref[...]
    p = jnp.maximum(p, 0.0)
    y = jnp.dot(p.astype(jnp.bfloat16), fc2w_ref[...],
                preferred_element_type=jnp.float32) + fc2b_ref[...]

    col = jax.lax.broadcasted_iota(jnp.int32, y.shape, 1)
    y = jnp.where(col < n_targets, y, -1e30)
    m = jnp.max(y, axis=-1, keepdims=True)
    e = jnp.exp(y - m)
    out_ref[0] = e / jnp.sum(e, axis=-1, keepdims=True)   # exact normalization


def gin_fused(ahat, x0, layer_params, fc1_w, fc1_b, fc2_w, fc2_b,
              *, window, tm, n_targets):
    n_pad = ahat.shape[0]
    h_pad = x0.shape[1]
    p_pad = fc1_w.shape[1]
    t_pad = fc2_w.shape[1]
    n_tiles = n_pad // tm
    w1s, w2s, biases = layer_params

    flops = window * (2 * n_pad * n_pad * h_pad
                      + 4 * n_pad * h_pad * h_pad
                      + 2 * n_pad * h_pad * p_pad
                      + 2 * n_pad * p_pad * t_pad)
    bytes_accessed = (ahat.size * 2 + x0.size * 2
                      + (w1s.size + w2s.size) * 2 + biases.size * 4
                      + (fc1_w.size + fc2_w.size) * 2
                      + (fc1_b.size + fc2_b.size) * 4
                      + window * n_pad * t_pad * 4)

    kernel = functools.partial(_gin_fused_kernel, tm=tm, n_pad=n_pad,
                               n_targets=n_targets)

    def per_layer(l, i):
        return (l, 0, 0)

    def resident2d(l, i):
        return (0, 0)

    return pl.pallas_call(
        kernel,
        out_shape=jax.ShapeDtypeStruct((window, n_pad, t_pad), jnp.float32),
        grid_spec=pltpu.PrefetchScalarGridSpec(
            num_scalar_prefetch=0,
            grid=(window, n_tiles),
            in_specs=[
                pl.BlockSpec((n_pad, n_pad), resident2d),   # Ahat, resident
                pl.BlockSpec((n_pad, h_pad), resident2d),   # x0 (bf16), resident
                pl.BlockSpec((1, h_pad, h_pad), per_layer),  # W1[l]
                pl.BlockSpec((1, h_pad, h_pad), per_layer),  # W2[l] (BN1 folded)
                pl.BlockSpec((1, 4, h_pad), per_layer),      # b1/b2/s2/t2 packed
                pl.BlockSpec((h_pad, p_pad), resident2d),    # fc1 W, resident
                pl.BlockSpec((1, p_pad), resident2d),        # fc1 b
                pl.BlockSpec((p_pad, t_pad), resident2d),    # fc2 W, resident
                pl.BlockSpec((1, t_pad), resident2d),        # fc2 b
            ],
            out_specs=pl.BlockSpec((1, tm, t_pad), lambda l, i: (l, i, 0)),
            scratch_shapes=[pltpu.VMEM((2, n_pad, h_pad), jnp.bfloat16)],
        ),
        compiler_params=pltpu.CompilerParams(
            # The layer axis carries the activation dependency through the
            # VMEM scratch (each layer needs *all* row tiles of the previous
            # one), so both axes must stay sequential on one core.
            dimension_semantics=("arbitrary", "arbitrary"),
            vmem_limit_bytes=_vmem_limit_bytes(),
        ),
        cost_estimate=pl.CostEstimate(
            flops=int(flops),
            transcendentals=int(window * n_pad * t_pad),
            bytes_accessed=int(bytes_accessed)),
    )(ahat, x0, w1s, w2s, biases, fc1_w, fc1_b, fc2_w, fc2_b)


# ---------------------------------------------------------------------------
# Full forward: adjacency build + padding in JAX glue; all heavy compute in
# the fused Pallas kernel.  The kernel already emits layer-major
# [window, N, t_pad] softmax outputs, so torch.transpose(x, 0, 1) is a no-op.
# ---------------------------------------------------------------------------
def gin_forward(x_features, edge_index, params):
    cfg = params["cfg"]
    window = cfg["window"]
    h_pad = cfg["h_pad"]
    n_targets = cfg["n_targets"]

    N, F = x_features.shape
    # tm up to 256 (fills the 256-wide MXU on v6e/v7x); offsets stay aligned
    # to bf16 (16, 128) sublane tiling because n_tiles > 1 only when tm == 256.
    tm = min(256, _round_up(N, 8))
    n_pad = _round_up(N, tm)

    eps = 0.0  # GINConv default (train_eps=False)
    src, dst = edge_index[0], edge_index[1]
    # Dense adjacency for sum aggregation: A[dst, src] += multiplicity.
    # TODO(synk): cache Ahat across calls when edge_index is static; this
    # O(N^2) scatter is per-forward glue and exact in bf16 only for
    # integer edge multiplicities <= 256.
    A = jnp.zeros((n_pad, n_pad), jnp.float32).at[dst, src].add(1.0)
    self_loop = jnp.where(jnp.arange(n_pad) < N, 1.0 + eps, 0.0)
    ahat = (A + jnp.diag(self_loop)).astype(jnp.bfloat16)

    x0 = jnp.zeros((n_pad, h_pad), jnp.float32)
    x0 = x0.at[:N, :F].set(x_features.astype(jnp.float32)).astype(jnp.bfloat16)

    probs = gin_fused(ahat, x0, params["layers"],
                      params["fc1_w"], params["fc1_b"],
                      params["fc2_w"], params["fc2_b"],
                      window=window, tm=tm, n_targets=n_targets)

    y = probs[:, :N, :n_targets]                 # [window, N, n_targets]
    assert n_targets % 3 == 0, "n_targets must be divisible by 3 for chunk(3)"
    c = n_targets // 3
    return y[..., :c], y[..., c:2 * c], y[..., 2 * c:]


# ---------------------------------------------------------------------------
# Deterministic parameter init (PyTorch Linear-style uniform(±1/sqrt(fan_in));
# fresh-init eval BatchNorm => scale 1/sqrt(1+eps_bn), shift 0; BN1 folded
# into Linear2).  All matmul weights zero-padded to lane-dense
# (multiple-of-128) shapes and stored in bf16; biases / BN params stay f32 and
# are packed into one (window, 4, h_pad) tensor.
# ---------------------------------------------------------------------------
def init_params(key, input_dim, hidden_dim, penultimate_dim, n_targets, window):
    h_pad = _round_up(max(input_dim, hidden_dim), 128)
    p_pad = _round_up(penultimate_dim, 128)
    t_pad = _round_up(n_targets, 128)

    def linear(k, fan_in, fan_out):
        k1, k2 = jax.random.split(k)
        bound = 1.0 / jnp.sqrt(jnp.float32(fan_in))
        w = jax.random.uniform(k1, (fan_in, fan_out), jnp.float32, -bound, bound)
        b = jax.random.uniform(k2, (fan_out,), jnp.float32, -bound, bound)
        return w, b

    keys = jax.random.split(key, 2 * window + 2)
    bn_eps = 1e-5
    s_bn = 1.0 / jnp.sqrt(1.0 + bn_eps)   # gamma=1, var=1, mean=0, beta=0

    w1s = jnp.zeros((window, h_pad, h_pad), jnp.float32)
    w2s = jnp.zeros((window, h_pad, h_pad), jnp.float32)
    # rows: 0 = b1, 1 = b2 (BN1 folded), 2 = BN2 scale, 3 = BN2 shift
    biases = jnp.zeros((window, 4, h_pad), jnp.float32)
    biases = biases.at[:, 2, :].set(1.0)

    d_in = input_dim
    for i in range(window):
        w1, b1 = linear(keys[2 * i], d_in, hidden_dim)
        w2, b2 = linear(keys[2 * i + 1], hidden_dim, hidden_dim)
        # Fold BN1 (between ReLU and Linear2): W2' = diag(s1)@W2, b2' = t1@W2 + b2
        s1 = jnp.full((hidden_dim,), s_bn, jnp.float32)
        t1 = jnp.zeros((hidden_dim,), jnp.float32)
        w2f = w2 * s1[:, None]
        b2f = t1 @ w2 + b2
        s2 = jnp.full((hidden_dim,), s_bn, jnp.float32)
        t2 = jnp.zeros((hidden_dim,), jnp.float32)

        w1s = w1s.at[i, :d_in, :hidden_dim].set(w1)
        w2s = w2s.at[i, :hidden_dim, :hidden_dim].set(w2f)
        biases = biases.at[i, 0, :hidden_dim].set(b1)
        biases = biases.at[i, 1, :hidden_dim].set(b2f)
        biases = biases.at[i, 2, :].set(0.0)
        biases = biases.at[i, 2, :hidden_dim].set(s2)
        biases = biases.at[i, 3, :hidden_dim].set(t2)
        d_in = hidden_dim

    fw1, fb1 = linear(keys[-2], hidden_dim, penultimate_dim)
    fw2, fb2 = linear(keys[-1], penultimate_dim, n_targets)
    fc1_w = jnp.zeros((h_pad, p_pad), jnp.float32).at[:hidden_dim, :penultimate_dim].set(fw1)
    fc1_b = jnp.zeros((1, p_pad), jnp.float32).at[0, :penultimate_dim].set(fb1)
    fc2_w = jnp.zeros((p_pad, t_pad), jnp.float32).at[:penultimate_dim, :n_targets].set(fw2)
    fc2_b = jnp.zeros((1, t_pad), jnp.float32).at[0, :n_targets].set(fb2)

    return dict(
        cfg=dict(window=window, h_pad=h_pad, p_pad=p_pad, t_pad=t_pad,
                 n_targets=n_targets),
        layers=(w1s.astype(jnp.bfloat16), w2s.astype(jnp.bfloat16), biases),
        fc1_w=fc1_w.astype(jnp.bfloat16), fc1_b=fc1_b,
        fc2_w=fc2_w.astype(jnp.bfloat16), fc2_b=fc2_b,
    )


if __name__ == "__main__":
    key = jax.random.PRNGKey(0)
    N, F = 8, 4                      # nodes, input feature dim
    hidden, penult = 32, 16
    n_targets, window = 3, 3
    n_edges = 16

    kx, ke1, ke2, kp = jax.random.split(key, 4)
    x_features = jax.random.normal(kx, (N, F), jnp.float32)
    src = jax.random.randint(ke1, (n_edges,), 0, N)
    dst = jax.random.randint(ke2, (n_edges,), 0, N)
    edge_index = jnp.stack([src, dst], axis=0)   # [2, E]

    params = init_params(kp, F, hidden, penult, n_targets, window)

    S, I, R = gin_forward(x_features, edge_index, params)
    jax.block_until_ready((S, I, R))

    assert S.shape == (window, N, n_targets // 3)
    assert I.shape == (window, N, n_targets // 3)
    assert R.shape == (window, N, n_targets // 3)
    # softmax rows must sum to one (exact division in f32)
    total = S.sum(-1) + I.sum(-1) + R.sum(-1)
    assert jnp.allclose(total, 1.0, atol=1e-3), total
    assert bool(jnp.all(jnp.isfinite(S)) & jnp.all(jnp.isfinite(I))
                & jnp.all(jnp.isfinite(R)))
    print("KERNEL_OK")
</pallas_src>

<mosaic_0001>
module attributes {stable_mosaic.version = 11 : i64} {
  func.func @_gin_fused_kernel(%arg0: i32, %arg1: i32, %arg2: memref<8x8xbf16, #tpu.memory_space<vmem>>, %arg3: memref<8x128xbf16, #tpu.memory_space<vmem>>, %arg4: memref<1x128x128xbf16, #tpu.memory_space<vmem>>, %arg5: memref<1x128x128xbf16, #tpu.memory_space<vmem>>, %arg6: memref<1x4x128xf32, #tpu.memory_space<vmem>>, %arg7: memref<128x128xbf16, #tpu.memory_space<vmem>>, %arg8: memref<1x128xf32, #tpu.memory_space<vmem>>, %arg9: memref<128x128xbf16, #tpu.memory_space<vmem>>, %arg10: memref<1x128xf32, #tpu.memory_space<vmem>>, %arg11: memref<1x8x128xf32, #tpu.memory_space<vmem>>, %arg12: memref<2x8x128xbf16, #tpu.memory_space<vmem>>) attributes {dimension_semantics = [#tpu.dimension_semantics<arbitrary>, #tpu.dimension_semantics<arbitrary>], iteration_bounds = array<i64: 3, 1>, scalar_prefetch = 0 : i64, scratch_operands = 1 : i64, tpu.core_type = #tpu.core_type<tc>, window_params = [{pipeline_mode = #tpu.pipeline_mode<synchronous>, transform_indices = @transform_0, window_bounds = array<i64: 8, 8>}, {pipeline_mode = #tpu.pipeline_mode<synchronous>, transform_indices = @transform_1, window_bounds = array<i64: 8, 128>}, {transform_indices = @transform_2, window_bounds = array<i64: 1, 128, 128>}, {transform_indices = @transform_3, window_bounds = array<i64: 1, 128, 128>}, {transform_indices = @transform_4, window_bounds = array<i64: 1, 4, 128>}, {pipeline_mode = #tpu.pipeline_mode<synchronous>, transform_indices = @transform_5, window_bounds = array<i64: 128, 128>}, {pipeline_mode = #tpu.pipeline_mode<synchronous>, transform_indices = @transform_6, window_bounds = array<i64: 1, 128>}, {pipeline_mode = #tpu.pipeline_mode<synchronous>, transform_indices = @transform_7, window_bounds = array<i64: 128, 128>}, {pipeline_mode = #tpu.pipeline_mode<synchronous>, transform_indices = @transform_8, window_bounds = array<i64: 1, 128>}, {transform_indices = @transform_9, window_bounds = array<i64: 1, 8, 128>}]} {
    %c0_i32 = arith.constant 0 : i32
    %0 = arith.cmpi eq, %arg0, %c0_i32 : i32
    %c0_i32_0 = arith.constant 0 : i32
    %1 = arith.cmpi eq, %arg1, %c0_i32_0 : i32
    %2 = arith.andi %0, %1 : i1
    %3 = arith.extui %2 : i1 to i32
    %c0_i32_1 = arith.constant 0 : i32
    %4 = arith.cmpi ne, %3, %c0_i32_1 : i32
    scf.if %4 {
      %c0_53 = arith.constant 0 : index
      %c0_54 = arith.constant 0 : index
      %100 = vector.load %arg3[%c0_53, %c0_54] : memref<8x128xbf16, #tpu.memory_space<vmem>>, vector<8x128xbf16>
      %c0_55 = arith.constant 0 : index
      %c0_56 = arith.constant 0 : index
      %c0_57 = arith.constant 0 : index
      %101 = vector.load %arg12[%c0_55, %c0_56, %c0_57] : memref<2x8x128xbf16, #tpu.memory_space<vmem>>, vector<1x8x128xbf16>
      %102 = vector.shape_cast %101 : vector<1x8x128xbf16> to vector<8x128xbf16>
      %103 = vector.shape_cast %100 : vector<8x128xbf16> to vector<1x8x128xbf16>
      tpu.vector_store %arg12[%c0_55, %c0_56, %c0_57], %103 {strides = array<i32>} : memref<2x8x128xbf16, #tpu.memory_space<vmem>>, vector<1x8x128xbf16>,
    } else {
    }
    %c8_i32 = arith.constant 8 : i32
    %5 = arith.muli %arg1, %c8_i32 : i32
    %6 = tpu.assume_multiple %5, 8 : i32
    %c2_i32 = arith.constant 2 : i32
    %c0_i32_2 = arith.constant 0 : i32
    %7 = arith.cmpi eq, %c2_i32, %c0_i32_2 : i32
    %c1_i32 = arith.constant 1 : i32
    %8 = arith.select %7, %c1_i32, %c2_i32 : i32
    %9 = arith.remsi %arg0, %8 : i32
    %c0_i32_3 = arith.constant 0 : i32
    %10 = arith.cmpi ne, %9, %c0_i32_3 : i32
    %c0_i32_4 = arith.constant 0 : i32
    %11 = arith.cmpi slt, %9, %c0_i32_4 : i32
    %c0_i32_5 = arith.constant 0 : i32
    %12 = arith.cmpi slt, %8, %c0_i32_5 : i32
    %13 = arith.xori %11, %12 : i1
    %14 = arith.andi %13, %10 : i1
    %15 = arith.addi %9, %8 : i32
    %16 = arith.select %14, %15, %9 : i32
    %c1_i32_6 = arith.constant 1 : i32
    %17 = arith.addi %arg0, %c1_i32_6 : i32
    %c2_i32_7 = arith.constant 2 : i32
    %c0_i32_8 = arith.constant 0 : i32
    %18 = arith.cmpi eq, %c2_i32_7, %c0_i32_8 : i32
    %c1_i32_9 = arith.constant 1 : i32
    %19 = arith.select %18, %c1_i32_9, %c2_i32_7 : i32
    %20 = arith.remsi %17, %19 : i32
    %c0_i32_10 = arith.constant 0 : i32
    %21 = arith.cmpi ne, %20, %c0_i32_10 : i32
    %c0_i32_11 = arith.constant 0 : i32
    %22 = arith.cmpi slt, %20, %c0_i32_11 : i32
    %c0_i32_12 = arith.constant 0 : i32
    %23 = arith.cmpi slt, %19, %c0_i32_12 : i32
    %24 = arith.xori %22, %23 : i1
    %25 = arith.andi %24, %21 : i1
    %26 = arith.addi %20, %19 : i32
    %27 = arith.select %25, %26, %20 : i32
    %28 = arith.index_cast %6 : i32 to index
    %c0 = arith.constant 0 : index
    %29 = vector.load %arg2[%28, %c0] : memref<8x8xbf16, #tpu.memory_space<vmem>>, vector<8x8xbf16>
    %30 = arith.index_cast %16 : i32 to index
    %c0_13 = arith.constant 0 : index
    %c0_14 = arith.constant 0 : index
    %31 = vector.load %arg12[%30, %c0_13, %c0_14] : memref<2x8x128xbf16, #tpu.memory_space<vmem>>, vector<1x8x128xbf16>
    %32 = vector.shape_cast %31 : vector<1x8x128xbf16> to vector<8x128xbf16>
    %cst = arith.constant dense<0.000000e+00> : vector<8x128xf32>
    %33 = tpu.matmul %29, %32, %cst {dimension_numbers = #tpu.dot_dimension_numbers<[1], [0], [0], [1], [0, 0, 1, 1], [], []>} : vector<8x8xbf16>, vector<8x128xbf16>, vector<8x128xf32> -> vector<8x128xf32>
    %c0_15 = arith.constant 0 : index
    %c0_16 = arith.constant 0 : index
    %c0_17 = arith.constant 0 : index
    %34 = vector.load %arg6[%c0_15, %c0_16, %c0_17] : memref<1x4x128xf32, #tpu.memory_space<vmem>>, vector<1x1x128xf32>
    %35 = vector.shape_cast %34 : vector<1x1x128xf32> to vector<1x128xf32>
    %c0_18 = arith.constant 0 : index
    %c1 = arith.constant 1 : index
    %c0_19 = arith.constant 0 : index
    %36 = vector.load %arg6[%c0_18, %c1, %c0_19] : memref<1x4x128xf32, #tpu.memory_space<vmem>>, vector<1x1x128xf32>
    %37 = vector.shape_cast %36 : vector<1x1x128xf32> to vector<1x128xf32>
    %c0_20 = arith.constant 0 : index
    %c2 = arith.constant 2 : index
    %c0_21 = arith.constant 0 : index
    %38 = vector.load %arg6[%c0_20, %c2, %c0_21] : memref<1x4x128xf32, #tpu.memory_space<vmem>>, vector<1x1x128xf32>
    %39 = vector.shape_cast %38 : vector<1x1x128xf32> to vector<1x128xf32>
    %c0_22 = arith.constant 0 : index
    %c3 = arith.constant 3 : index
    %c0_23 = arith.constant 0 : index
    %40 = vector.load %arg6[%c0_22, %c3, %c0_23] : memref<1x4x128xf32, #tpu.memory_space<vmem>>, vector<1x1x128xf32>
    %41 = vector.shape_cast %40 : vector<1x1x128xf32> to vector<1x128xf32>
    %42 = arith.truncf %33 : vector<8x128xf32> to vector<8x128xbf16>
    %c0_24 = arith.constant 0 : index
    %c0_25 = arith.constant 0 : index
    %c0_26 = arith.constant 0 : index
    %43 = vector.load %arg4[%c0_24, %c0_25, %c0_26] : memref<1x128x128xbf16, #tpu.memory_space<vmem>>, vector<1x128x128xbf16>
    %44 = vector.shape_cast %43 : vector<1x128x128xbf16> to vector<128x128xbf16>
    %cst_27 = arith.constant dense<0.000000e+00> : vector<8x128xf32>
    %45 = tpu.matmul %42, %44, %cst_27 {dimension_numbers = #tpu.dot_dimension_numbers<[1], [0], [0], [1], [0, 0, 1, 1], [], []>} : vector<8x128xbf16>, vector<128x128xbf16>, vector<8x128xf32> -> vector<8x128xf32>
    %46 = vector.broadcast %35 : vector<1x128xf32> to vector<8x128xf32>
    %47 = arith.addf %45, %46 : vector<8x128xf32>
    %cst_28 = arith.constant 0.000000e+00 : f32
    %48 = vector.broadcast %cst_28 : f32 to vector<8x128xf32>
    %49 = arith.maximumf %47, %48 : vector<8x128xf32>
    %50 = arith.truncf %49 : vector<8x128xf32> to vector<8x128xbf16>
    %c0_29 = arith.constant 0 : index
    %c0_30 = arith.constant 0 : index
    %c0_31 = arith.constant 0 : index
    %51 = vector.load %arg5[%c0_29, %c0_30, %c0_31] : memref<1x128x128xbf16, #tpu.memory_space<vmem>>, vector<1x128x128xbf16>
    %52 = vector.shape_cast %51 : vector<1x128x128xbf16> to vector<128x128xbf16>
    %cst_32 = arith.constant dense<0.000000e+00> : vector<8x128xf32>
    %53 = tpu.matmul %50, %52, %cst_32 {dimension_numbers = #tpu.dot_dimension_numbers<[1], [0], [0], [1], [0, 0, 1, 1], [], []>} : vector<8x128xbf16>, vector<128x128xbf16>, vector<8x128xf32> -> vector<8x128xf32>
    %54 = vector.broadcast %37 : vector<1x128xf32> to vector<8x128xf32>
    %55 = arith.addf %53, %54 : vector<8x128xf32>
    %cst_33 = arith.constant 0.000000e+00 : f32
    %56 = vector.broadcast %cst_33 : f32 to vector<8x128xf32>
    %57 = arith.maximumf %55, %56 : vector<8x128xf32>
    %58 = vector.broadcast %39 : vector<1x128xf32> to vector<8x128xf32>
    %59 = arith.mulf %57, %58 : vector<8x128xf32>
    %60 = vector.broadcast %41 : vector<1x128xf32> to vector<8x128xf32>
    %61 = arith.addf %59, %60 : vector<8x128xf32>
    %cst_34 = arith.constant 0.000000e+00 : f32
    %62 = vector.broadcast %cst_34 : f32 to vector<8x128xf32>
    %63 = arith.maximumf %61, %62 : vector<8x128xf32>
    %64 = arith.truncf %63 : vector<8x128xf32> to vector<8x128xbf16>
    %65 = arith.index_cast %27 : i32 to index
    %66 = arith.index_cast %6 : i32 to index
    %c0_35 = arith.constant 0 : index
    %67 = vector.load %arg12[%65, %66, %c0_35] : memref<2x8x128xbf16, #tpu.memory_space<vmem>>, vector<1x8x128xbf16>
    %68 = vector.shape_cast %67 : vector<1x8x128xbf16> to vector<8x128xbf16>
    %69 = vector.shape_cast %64 : vector<8x128xbf16> to vector<1x8x128xbf16>
    tpu.vector_store %arg12[%65, %66, %c0_35], %69 {strides = array<i32>} : memref<2x8x128xbf16, #tpu.memory_space<vmem>>, vector<1x8x128xbf16>,
    %c0_36 = arith.constant 0 : index
    %c0_37 = arith.constant 0 : index
    %70 = vector.load %arg7[%c0_36, %c0_37] : memref<128x128xbf16, #tpu.memory_space<vmem>>, vector<128x128xbf16>
    %cst_38 = arith.constant dense<0.000000e+00> : vector<8x128xf32>
    %71 = tpu.matmul %64, %70, %cst_38 {dimension_numbers = #tpu.dot_dimension_numbers<[1], [0], [0], [1], [0, 0, 1, 1], [], []>} : vector<8x128xbf16>, vector<128x128xbf16>, vector<8x128xf32> -> vector<8x128xf32>
    %c0_39 = arith.constant 0 : index
    %c0_40 = arith.constant 0 : index
    %72 = vector.load %arg8[%c0_39, %c0_40] : memref<1x128xf32, #tpu.memory_space<vmem>>, vector<1x128xf32>
    %73 = vector.broadcast %72 : vector<1x128xf32> to vector<8x128xf32>
    %74 = arith.addf %71, %73 : vector<8x128xf32>
    %cst_41 = arith.constant 0.000000e+00 : f32
    %75 = vector.broadcast %cst_41 : f32 to vector<8x128xf32>
    %76 = arith.maximumf %74, %75 : vector<8x128xf32>
    %77 = arith.truncf %76 : vector<8x128xf32> to vector<8x128xbf16>
    %c0_42 = arith.constant 0 : index
    %c0_43 = arith.constant 0 : index
    %78 = vector.load %arg9[%c0_42, %c0_43] : memref<128x128xbf16, #tpu.memory_space<vmem>>, vector<128x128xbf16>
    %cst_44 = arith.constant dense<0.000000e+00> : vector<8x128xf32>
    %79 = tpu.matmul %77, %78, %cst_44 {dimension_numbers = #tpu.dot_dimension_numbers<[1], [0], [0], [1], [0, 0, 1, 1], [], []>} : vector<8x128xbf16>, vector<128x128xbf16>, vector<8x128xf32> -> vector<8x128xf32>
    %c0_45 = arith.constant 0 : index
    %c0_46 = arith.constant 0 : index
    %80 = vector.load %arg10[%c0_45, %c0_46] : memref<1x128xf32, #tpu.memory_space<vmem>>, vector<1x128xf32>
    %81 = vector.broadcast %80 : vector<1x128xf32> to vector<8x128xf32>
    %82 = arith.addf %79, %81 : vector<8x128xf32>
    %83 = tpu.iota {dimensions = array<i32: 1>} : vector<8x128xi32>
    %c3_i32 = arith.constant 3 : i32
    %84 = vector.broadcast %c3_i32 : i32 to vector<8x128xi32>
    %85 = arith.cmpi slt, %83, %84 : vector<8x128xi32>
    %cst_47 = arith.constant -1.000000e+30 : f32
    %86 = vector.broadcast %cst_47 : f32 to vector<8x128xf32>
    %87 = arith.select %85, %82, %86 : vector<8x128xi1>, vector<8x128xf32>
    %cst_48 = arith.constant dense<0xFF800000> : vector<8xf32>
    %88 = vector.multi_reduction <maximumf>, %87, %cst_48 [1] : vector<8x128xf32> to vector<8xf32>
    %89 = vector.shape_cast %88 : vector<8xf32> to vector<8x1xf32>
    %90 = vector.broadcast %89 : vector<8x1xf32> to vector<8x128xf32>
    %91 = arith.subf %87, %90 : vector<8x128xf32>
    %92 = math.exp %91 : vector<8x128xf32>
    %cst_49 = arith.constant dense<0.000000e+00> : vector<8xf32>
    %93 = vector.multi_reduction <add>, %92, %cst_49 [1] : vector<8x128xf32> to vector<8xf32>
    %94 = vector.shape_cast %93 : vector<8xf32> to vector<8x1xf32>
    %95 = vector.broadcast %94 : vector<8x1xf32> to vector<8x128xf32>
    %96 = arith.divf %92, %95 : vector<8x128xf32>
    %c0_50 = arith.constant 0 : index
    %c0_51 = arith.constant 0 : index
    %c0_52 = arith.constant 0 : index
    %97 = vector.load %arg11[%c0_50, %c0_51, %c0_52] : memref<1x8x128xf32, #tpu.memory_space<vmem>>, vector<1x8x128xf32>
    %98 = vector.shape_cast %97 : vector<1x8x128xf32> to vector<8x128xf32>
    %99 = vector.shape_cast %96 : vector<8x128xf32> to vector<1x8x128xf32>
    tpu.vector_store %arg11[%c0_50, %c0_51, %c0_52], %99 {strides = array<i32>} : memref<1x8x128xf32, #tpu.memory_space<vmem>>, vector<1x8x128xf32>,
    return
  }
  func.func @transform_0(%arg0: i32, %arg1: i32) -> (i32, i32) {
    %c0_i32 = arith.constant 0 : i32
    %c0_i32_0 = arith.constant 0 : i32
    %c0_i32_1 = arith.constant 0 : i32
    return %c0_i32, %c0_i32_0 : i32, i32
  }
  func.func @transform_1(%arg0: i32, %arg1: i32) -> (i32, i32) {
    %c0_i32 = arith.constant 0 : i32
    %c0_i32_0 = arith.constant 0 : i32
    %c0_i32_1 = arith.constant 0 : i32
    return %c0_i32, %c0_i32_0 : i32, i32
  }
  func.func @transform_2(%arg0: i32, %arg1: i32) -> (i32, i32, i32) {
    %c0_i32 = arith.constant 0 : i32
    %c0_i32_0 = arith.constant 0 : i32
    %c0_i32_1 = arith.constant 0 : i32
    return %arg0, %c0_i32, %c0_i32_0 : i32, i32, i32
  }
  func.func @transform_3(%arg0: i32, %arg1: i32) -> (i32, i32, i32) {
    %c0_i32 = arith.constant 0 : i32
    %c0_i32_0 = arith.constant 0 : i32
    %c0_i32_1 = arith.constant 0 : i32
    return %arg0, %c0_i32, %c0_i32_0 : i32, i32, i32
  }
  func.func @transform_4(%arg0: i32, %arg1: i32) -> (i32, i32, i32) {
    %c0_i32 = arith.constant 0 : i32
    %c0_i32_0 = arith.constant 0 : i32
    %c0_i32_1 = arith.constant 0 : i32
    return %arg0, %c0_i32, %c0_i32_0 : i32, i32, i32
  }
  func.func @transform_5(%arg0: i32, %arg1: i32) -> (i32, i32) {
    %c0_i32 = arith.constant 0 : i32
    %c0_i32_0 = arith.constant 0 : i32
    %c0_i32_1 = arith.constant 0 : i32
    return %c0_i32, %c0_i32_0 : i32, i32
  }
  func.func @transform_6(%arg0: i32, %arg1: i32) -> (i32, i32) {
    %c0_i32 = arith.constant 0 : i32
    %c0_i32_0 = arith.constant 0 : i32
    %c0_i32_1 = arith.constant 0 : i32
    return %c0_i32, %c0_i32_0 : i32, i32
  }
  func.func @transform_7(%arg0: i32, %arg1: i32) -> (i32, i32) {
    %c0_i32 = arith.constant 0 : i32
    %c0_i32_0 = arith.constant 0 : i32
    %c0_i32_1 = arith.constant 0 : i32
    return %c0_i32, %c0_i32_0 : i32, i32
  }
  func.func @transform_8(%arg0: i32, %arg1: i32) -> (i32, i32) {
    %c0_i32 = arith.constant 0 : i32
    %c0_i32_0 = arith.constant 0 : i32
    %c0_i32_1 = arith.constant 0 : i32
    return %c0_i32, %c0_i32_0 : i32, i32
  }
  func.func @transform_9(%arg0: i32, %arg1: i32) -> (i32, i32, i32) {
    %c0_i32 = arith.constant 0 : i32
    %c0_i32_0 = arith.constant 0 : i32
    return %arg0, %arg1, %c0_i32 : i32, i32, i32
  }
}

</mosaic_0001>

<bundles_post_ra>
// kernel: tpu_custom_call.1
= control target key start
LH: loop header
LB: loop body
LE: loop exit
PB: predicated region body
PF: predicated region fallthrough
CT: control target
= control target key end

     0   :  { %s2271_s0 = inlined_call_operand.hbm [shape: bf16[8,8], index: 0, kind: input, shape index: {}]   ;;  %s2272_s1 = inlined_call_operand.hbm [shape: bf16[8,128], index: 1, kind: input, shape index: {}]   ;;  %s2273_s2 = inlined_call_operand.hbm [shape: bf16[3,128,128], index: 2, kind: input, shape index: {}]   ;;  %s2274_s3 = inlined_call_operand.hbm [shape: bf16[3,128,128], index: 3, kind: input, shape index: {}]   ;;  %s2275_s4 = inlined_call_operand.hbm [shape: f32[3,4,128], index: 4, kind: input, shape index: {}]   ;;  %s2276_s5 = inlined_call_operand.hbm [shape: bf16[128,128], index: 5, kind: input, shape index: {}]   ;;  %s2277_s6 = inlined_call_operand.vmem [shape: f32[1,128], index: 6, kind: input, shape index: {}]   ;;  %s2278_s7 = inlined_call_operand.hbm [shape: bf16[128,128], index: 7, kind: input, shape index: {}]   ;;  %s2279_s8 = inlined_call_operand.vmem [shape: f32[1,128], index: 8, kind: input, shape index: {}]   ;;  %s2280_s9 = inlined_call_operand.hbm [shape: f32[3,8,128], index: 9, kind: output, shape index: {}]  }
   0x1   :  { %2295 = sst [smem:[#allocation26_spill]] %s2271_s0 }
   0x2   :  { %2296 = sst [smem:[#allocation27_spill]] %s2272_s1 }
   0x3   :  { %2297 = sst [smem:[#allocation28_spill]] %s2273_s2 }
   0x4   :  { %2298 = sst [smem:[#allocation29_spill]] %s2274_s3 }
   0x5   :  { %14 = vsyncpa [#allocation4], 0 }
   0x6   :  { %15 = vsyncpa [#allocation7], 0 }
   0x7   :  { %16 = vsyncpa [#allocation13], 0 }
   0x8   :  { %17 = vsyncpa [#allocation5], 0 }
   0x9   :  { %19 = vsyncpa [#allocation5 + $0x1], 0  ;;  %s1941_s30 = smov 0   ;;  %s1943_s10 = smov 0  }
   0xa   :  { %s1945_s11 = smov 0   ;;  %s1947_s12 = smov 0  }
   0xb   :  { %s1949_s13 = smov 0   ;;  %s1951_s14 = smov 0  }
   0xc LB: > { %2299 = sst [smem:[#allocation21_spill]] %s1857_s30  ;;  %s1972_s15 = sadd.s32 4294967295, %s1877_s14   ;;  %s1877_s14 = sphi %s1951_s14, %s25_s14   ;;  %s1873_s13 = sphi %s1949_s13, %s2342_s13   ;;  %s1869_s12 = sphi %s1947_s12, %s2341_s12   ;;  %s1865_s11 = sphi %s1945_s11, %s2340_s11   ;;  %s1861_s10 = sphi %s1943_s10, %s2339_s10   ;;  %s1857_s30 = sphi %s1941_s30, %s2338_s30  }
   0xd   : > { %2300 = sst [smem:[#allocation22_spill]] %s1877_s14  ;;  %s1237_s16 = sadd.s32 4294967294, %s1877_s14  }
   0xe   : > { %p99_p0 = scmp.ne.s32.totalorder %s1861_s10, %s1857_s30  ;;  %p2287_p1 = scmp.eq.s32.totalorder %s1972_s15, 0 }
   0xf   : > { %p267_p3 = scmp.eq.s32.totalorder %s1237_s16, 2  ;;  %p1238_p5 = scmp.ge.s32.totalorder %s1877_s14, 1 }
  0x10   : > { %p1981_p4 = por %p2287_p1, %p99_p0  ;;  %p274_p7 = scmp.lt.s32.totalorder %s1877_s14, 4 }
  0x11   : > { %p1986_p6 = por %p267_p3, %p99_p0  ;;  %s1879_s20 = smov [#allocation3]  }
  0x12   : > { %p1991_p8 = pnand %p1238_p5, %p274_p7  ;;  %s287_s21 = sshll.u32 %s1879_s20, 4  ;;  %s288_s21 = int_to_ptr.vmem [resolvable:$true] %s287_s21 }
  0x13   : > { %s2302_s18 = scalar_select %p1986_p6, 1, 0 }
  0x14   : > { %p1464_p9 = pneg %p1991_p8  ;;  %s37_s23 = sadd.s32 1, %s1873_s13 }
  0x15   : > { %2303 = sst [smem:[#allocation23_spill]] %s2302_s18  ;;  %s86_s24 = sadd.s32 1, %s1865_s11 }
  0x16   : > { %p1999_p10 = pnand %p1464_p9, %p2287_p1  ;;  %p39_p11 = scmp.ge.s32.totalorder %s37_s23, 3 }
  0x17   : > { %s1604_s25 = scalar_lea.vmem %s288_s21, 64  ;;  %p1612_p5 = scmp.lt.s32.totalorder %s288_s21, %s288_s21 }
  0x18   : > { %p2288_p12 = pneg %p1999_p10  ;;  %p1605_p13 = scmp.ne.s32.totalorder %s288_s21, %s1604_s25 }
  0x19   : > { %p1613_p7 = scmp.lt.s32.totalorder %s1604_s25, %s1604_s25 }
  0x1a   : > { %p1607_p0 = pnand %p1605_p13, %p2288_p12 }
  0x1b   : > { %p1614_p2 = por %p1613_p7, %p1612_p5 }
  0x1c   : > { %p1608_p3 = pneg %p1607_p0 }
  0x1e   : > { %p1615_p9 = pnand %p1614_p2, %p1608_p3 }
  0x20   : > { %1618 = shalt.err (!%p1615_p9)
}
  0x21   : > { %s2306_s0 = sld [smem:[#allocation26_spill]]  ;;  %s2344_s23 = smov (%p39_p11, %s37_s23), 0 }
  0x22   : > { %2307 = sst [smem:[#allocation24_spill]] %s2344_s23  ;;  %p93_p2 = scmp.ne.s32.totalorder %s1865_s11, %s1861_s10 }
  0x23   : > { %p94_p13 = scmp.eq.s32.totalorder %s1877_s14, 0  ;;  %s83_s28 = ssub.s32 %s1873_s13, %s2344_s23 }
  0x24   : > { %p84_p0 = scmp.eq.s32.totalorder %s83_s28, 0  ;;  %p2308_p5 = scmp.eq.s32.totalorder %s1972_s15, 2 }
  0x25   : > { %p95_p3 = por %p94_p13, %p93_p2  ;;  %p1495_p9 = scmp.lt.s32.totalorder %s1877_s14, 3 }
  0x26   : > { %p2024_p7 = por %p2308_p5, %p93_p2  ;;  %s341_s20 = sand.u32 1, %s1877_s14  }
  0x27   : > { %1467 = dma.hbm_to_vmem [thread:$0]  (!%p1999_p10), %s2306_s0, 64, %s288_s21, [#allocation4]  }
  0x28   : > { %s2029_s16 = scalar_select %p84_p0, %s1865_s11, %s86_s24  }
  0x29   : > { %s2284_s25 = sand.u32 1, %s1865_s11   ;;  %s2289_s26 = sshll.u32 %s1873_s13, 10 }
  0x2a   : > { %2310 = sst [smem:[#allocation25_spill]] %s2029_s16  ;;  %s2036_s21 = sshll.u32 %s2284_s25, 6 }
  0x2b   : > { %s2311_s2 = sld [smem:[#allocation28_spill]]  ;;  %s345_s23 = scalar_lea.vmem [#allocation8], %s2036_s21 }
  0x2c   : > { %s352_s18 = sshll.u32 %s345_s23, 4  ;;  %p2045_p11 = pnand %p1495_p9, %p95_p3  ;;  %s353_s18 = int_to_ptr.vmem [resolvable:$true] %s352_s18 }
  0x2d   : > { %s1880_s24 = smov [#allocation6]   ;;  %s2049_s25 = scalar_lea.sflag [#allocation4], %s341_s20 }
  0x2e   : > { %s298_s16 = sshll.u32 %s1880_s24, 4  ;;  %p2290_p2 = pneg %p2045_p11  ;;  %s299_s16 = int_to_ptr.vmem [resolvable:$true] %s298_s16 }
  0x2f   : > { %s1632_s14 = scalar_lea.vmem %s353_s18, 1024  ;;  %s1881_s0 = smov [#allocation8]  }
  0x30   : > { %p1633_p13 = scmp.ne.s32.totalorder %s353_s18, %s1632_s14  ;;  %s1637_s23 = sshll.u32 %s1881_s0, 4  ;;  %s1638_s23 = int_to_ptr.vmem [resolvable:$false] %s1637_s23 }
  0x31   : > { %s351_s28 = scalar_lea.hbm %s2311_s2, %s2289_s26  ;;  %s1639_s27 = scalar_lea.vmem %s1638_s23, 2048 }
  0x32   : > { %p1635_p0 = pnand %p1633_p13, %p2290_p2  ;;  %p1640_p3 = scmp.lt.s32.totalorder %s353_s18, %s1638_s23 }
  0x33   : > { %p1641_p9 = scmp.lt.s32.totalorder %s1639_s27, %s1632_s14 }
  0x34   : > { %p1636_p5 = pneg %p1635_p0 }
  0x35   : > { %p1642_p1 = por %p1641_p9, %p1640_p3 }
  0x37   : > { %p1643_p12 = pnand %p1642_p1, %p1636_p5 }
  0x39   : > { %1646 = shalt.err (!%p1643_p12)
}
  0x3a   : > { %s2291_s24 = smov 64   ;;  %s2293_s20 = smov 4  }
  0x3b   : > { %1480 = dma.hbm_to_vmem [thread:$0]  (!%p2045_p11), %s351_s28, 1024, %s353_s18, %s2049_s25, %s2291_s24, %s2291_s24, %s2293_s20  }
  0x3c   : > { %s1658_s26 = scalar_lea.vmem %s299_s16, 64  ;;  %p2313_p0 = pneg %p1999_p10 }
  0x3d   : > { %p1659_p13 = scmp.ne.s32.totalorder %s299_s16, %s1658_s26  ;;  %p1666_p3 = scmp.lt.s32.totalorder %s299_s16, %s299_s16 }
  0x3e   : > { %p1667_p1 = scmp.lt.s32.totalorder %s1658_s26, %s1658_s26 }
  0x3f   : > { %p1661_p2 = pnand %p1659_p13, %p2313_p0 }
  0x40   : > { %p1668_p12 = por %p1667_p1, %p1666_p3 }
  0x41   : > { %p1662_p6 = pneg %p1661_p2 }
  0x43   : > { %p1669_p5 = pnand %p1668_p12, %p1662_p6 }
  0x45   : > { %1672 = shalt.err (!%p1669_p5)
}
  0x46   : > { %s2314_s1 = sld [smem:[#allocation27_spill]]  ;;  %s2315_s18 = sshll.u32 %s1873_s13, 10 }
  0x47   : > { %s2316_s3 = sld [smem:[#allocation29_spill]]  ;;  %s366_s24 = scalar_lea.vmem [#allocation9], %s2036_s21 }
  0x48   : > { %s373_s20 = sshll.u32 %s366_s24, 4  ;;  %p2317_p2 = pneg %p2045_p11  ;;  %s374_s20 = int_to_ptr.vmem [resolvable:$true] %s373_s20 }
  0x49   : > { %s1686_s26 = scalar_lea.vmem %s374_s20, 1024  ;;  %s1884_s2 = smov [#allocation9]  }
  0x4a   : > { %p1687_p6 = scmp.ne.s32.totalorder %s374_s20, %s1686_s26  ;;  %s1691_s14 = sshll.u32 %s1884_s2, 4  ;;  %s1692_s14 = int_to_ptr.vmem [resolvable:$false] %s1691_s14 }
  0x4b   : > { %s1693_s0 = scalar_lea.vmem %s1692_s14, 2048  ;;  %p1694_p0 = scmp.lt.s32.totalorder %s374_s20, %s1692_s14 }
  0x4c   : > { %1470 = dma.hbm_to_vmem [thread:$0]  (!%p1999_p10), %s2314_s1, 64, %s299_s16, [#allocation7]  }
  0x4d   : > { %s372_s27 = scalar_lea.hbm %s2316_s3, %s2315_s18  ;;  %p1689_p9 = pnand %p1687_p6, %p2317_p2 }
  0x4e   : > { %p1695_p3 = scmp.lt.s32.totalorder %s1693_s0, %s1686_s26 }
  0x4f   : > { %p1690_p13 = pneg %p1689_p9 }
  0x50   : > { %p1696_p1 = por %p1695_p3, %p1694_p0 }
  0x52   : > { %p1697_p12 = pnand %p1696_p1, %p1690_p13 }
  0x54   : > { %1700 = shalt.err (!%p1697_p12)
}
  0x55   : > { %s2318_s16 = smov 4   ;;  %s2319_s21 = smov 64  }
  0x56   : > { %1483 = dma.hbm_to_vmem [thread:$0]  (!%p2045_p11), %s372_s27, 1024, %s374_s20, %s2049_s25, %s2319_s21, %s2319_s21, %s2318_s16  }
  0x57   : > { %s1885_s24 = smov [#allocation11]   ;;  %s1886_s28 = smov [#allocation12]  }
  0x58   : > { %s308_s18 = sshll.u32 %s1885_s24, 4  ;;  %s324_s2 = sshll.u32 %s1886_s28, 4  ;;  %s309_s18 = int_to_ptr.vmem [resolvable:$true] %s308_s18  ;;  %s325_s2 = int_to_ptr.vmem [resolvable:$true] %s324_s2 }
  0x59   : > { %s1712_s23 = scalar_lea.vmem %s309_s18, 1024  ;;  %p2320_p6 = pneg %p1999_p10 }
  0x5a   : > { %p1713_p5 = scmp.ne.s32.totalorder %s309_s18, %s1712_s23  ;;  %p1720_p13 = scmp.lt.s32.totalorder %s309_s18, %s309_s18 }
  0x5b   : > { %p1721_p0 = scmp.lt.s32.totalorder %s1712_s23, %s1712_s23 }
  0x5c   : > { %p1715_p2 = pnand %p1713_p5, %p2320_p6 }
  0x5d   : > { %p1722_p3 = por %p1721_p0, %p1720_p13 }
  0x5e   : > { %p1716_p9 = pneg %p1715_p2 }
  0x60   : > { %p1723_p1 = pnand %p1722_p3, %p1716_p9 }
  0x62   : > { %1726 = shalt.err (!%p1723_p1)
}
  0x63   : > { %1473 = dma.hbm_to_vmem [thread:$0]  (!%p1999_p10), %s2276_s5, 1024, %s309_s18, [#allocation7], %s2319_s21, %s2319_s21, %s2318_s16  }
  0x64   : > { %s2321_s26 = sand.u32 1, %s1865_s11   ;;  %s1738_s0 = scalar_lea.vmem %s325_s2, 1024 }
  0x65   : > { %s1250_s14 = sshll.u32 %s2321_s26, 2  ;;  %p1739_p12 = scmp.ne.s32.totalorder %s325_s2, %s1738_s0 }
  0x66   : > { %p2322_p5 = pmov %p2320_p6  ;;  %p1746_p9 = scmp.lt.s32.totalorder %s325_s2, %s325_s2 }
  0x67   : > { %p1747_p13 = scmp.lt.s32.totalorder %s1738_s0, %s1738_s0 }
  0x68   : > { %p1741_p6 = pnand %p1739_p12, %p2322_p5 }
  0x69   : > { %p1748_p0 = por %p1747_p13, %p1746_p9 }
  0x6a   : > { %p1742_p2 = pneg %p1741_p6 }
  0x6c   : > { %p1749_p3 = pnand %p1748_p0, %p1742_p2 }
  0x6e   : > { %1752 = shalt.err (!%p1749_p3)
}
  0x6f   : > { %1476 = dma.hbm_to_vmem [thread:$0]  (!%p1999_p10), %s2278_s7, 1024, %s325_s2, [#allocation13], %s2319_s21, %s2319_s21, %s2318_s16  }
  0x70   : > { %s1251_s28 = sshll.u32 %s1873_s13, 6  ;;  %s387_s26 = scalar_lea.vmem [#allocation10], %s1250_s14 }
  0x71   : > { %s392_s27 = scalar_lea.hbm %s2275_s4, %s1251_s28  ;;  %s394_s0 = sshll.u32 %s387_s26, 4  ;;  %s395_s0 = int_to_ptr.vmem [resolvable:$true] %s394_s0 }
  0x72   : > { %s1766_s1 = scalar_lea.vmem %s395_s0, 64  ;;  %p2323_p12 = pneg %p2045_p11 }
  0x73   : > { %p1767_p1 = scmp.ne.s32.totalorder %s395_s0, %s1766_s1  ;;  %s1887_s22 = smov [#allocation10]  }
  0x74   : > { %s1771_s3 = sshll.u32 %s1887_s22, 4  ;;  %s1772_s3 = int_to_ptr.vmem [resolvable:$false] %s1771_s3 }
  0x75   : > { %p1769_p5 = pnand %p1767_p1, %p2323_p12  ;;  %s1773_s24 = scalar_lea.vmem %s1772_s3, 128 }
  0x76   : > { %p1774_p2 = scmp.lt.s32.totalorder %s395_s0, %s1772_s3  ;;  %p1775_p10 = scmp.lt.s32.totalorder %s1773_s24, %s1766_s1 }
  0x77   : > { %p1770_p6 = pneg %p1769_p5 }
  0x78   : > { %p1776_p9 = por %p1775_p10, %p1774_p2 }
  0x7a   : > { %p1777_p13 = pnand %p1776_p9, %p1770_p6 }
  0x7c   : > { %1780 = shalt.err (!%p1777_p13)
}
  0x7d   : > { %1486 = dma.hbm_to_vmem [thread:$0]  (!%p2045_p11), %s392_s27, 64, %s395_s0, %s2049_s25  }
  0x7e   : > { %403 = sbr.rel (%p1991_p8) target bundleno = 1485 (0x5cd), region = 56  ;;  %p2324_p0 = scmp.eq.s32.totalorder (!%p1991_p8), %s1972_s15, 0 }
  0x83   : > { %1832 = dma.done.wait (%p2324_p0), [#allocation4], 64   ;;  %p2325_p3 = pmov %p2324_p0 }
  0x84   : > { %p2326_p1 = pmov %p2324_p0 }
  0x85   : > { %1834 = vsyncadd (%p2325_p3), [#allocation4], 4294967232 }
  0x86   : > { %1836 = dma.done.wait (%p2326_p1), [#allocation7], 64   ;;  %p2327_p12 = pmov %p2324_p0 }
  0x87   : > { %s413_s1 = sand.u32 1, %s1972_s15   ;;  %s2131_s3 = sand.u32 1, %s1861_s10  }
  0x88   : > { %1838 = vsyncadd (%p2327_p12), [#allocation7], 4294967232  ;;  %s1255_s30 = sshll.u32 %s2131_s3, 6  ;;  %s414_s19 = scalar_lea.sflag [#allocation4], %s413_s1 }
  0x89   : > { %s2134_s25 = scalar_lea.vmem [#allocation8], %s1255_s30 }
  0x8a   : > { %1840 = dma.done.wait (%p1981_p4), %s414_s19, 2112  }
  0x8b   : > { %1842 = vsyncadd (%p1981_p4), %s414_s19, 4294965184  ;;  %s1257_s16 = sshll.u32 %s2131_s3, 2  ;;  %s2141_s21 = scalar_lea.vmem [#allocation9], %s1255_s30 }
  0x8c   : > { %s2143_s2 = scalar_lea.vmem [#allocation10], %s1257_s16  ;;  %p2328_p8 = pmov %p2324_p0 }
  0x8d   : > { %p2329_p11 = pmov %p2324_p0 }
  0x8e   : > { %1844 = dma.done.wait (%p2328_p8), [#allocation7], 1024  }
  0x8f   : > { %1846 = vsyncadd (%p2329_p11), [#allocation7], 4294966272  ;;  %p2330_p5 = pmov %p2324_p0 }
  0x90   : > { %p2331_p6 = pmov %p2324_p0 }
  0x91   : > { %1848 = dma.done.wait (%p2330_p5), [#allocation13], 1024  }
  0x92   : > { %1850 = vsyncadd (%p2331_p6), [#allocation13], 4294966272  ;;  %s1260_s17 = sshll.u32 %s2131_s3, 3  ;;  %p489_p4 = scmp.eq.s32.totalorder %s1869_s12, 0 }
  0x93   : > { %s2155_s14 = scalar_lea.vmem [#allocation14], %s1260_s17  ;;  %v495_v0 = vld [vmem:[#allocation6] sm:$0xf] (%p489_p4) }
  0x94   : > { %494 = sbr.rel (!%p489_p4) target bundleno = 153 (0x99), region = 88  ;;  %496 = vst [vmem:[#allocation2] sm:$0xf] (%p489_p4), %v495_v0 }
  0x99 PF: > { %p498_p2 = scmp.lt.s32.totalorder %s1869_s12, 0  ;;  %s499_s18 = ssub.s32 0, %s1869_s12  ;;  %v1888_v1 = vmov 0.0   ;;  %vm1889_vm0 = vmmov 0   ;;  %v1557_v2 = vld [vmem:[%s2134_s25 + $0x38] sm:$0xff]   ;;  %v1558_v3 = vld [vmem:[%s2134_s25 + $0x30] sm:$0xff]  }
  0x9a   : > { %1354 = vmatprep.subr.bf16.mxu0 %v1888_v1  ;;  %s1262_s15 = smin.u32 %s1869_s12, %s499_s18  ;;  %1356 = vmatprep.mubr.msk.bf16.mxu0 %vm1889_vm0, %v1888_v1  ;;  %v1559_v4 = vld [vmem:[%s2134_s25 + $0x28] sm:$0xff]   ;;  %vm535_vm1 = vcmask 1043456   ;;  %v1560_v5 = vld [vmem:[%s2134_s25 + $0x20] sm:$0xff]   ;;  %v527_v7 = vld [vmem:[#allocation3] sm:$0xf]  ;;  %vm531_vm2 = vcmask 64512  }
  0x9b   : > { %s501_s28 = sand.u32 1, %s1262_s15   ;;  %1360 = vmatprep.subr.bf16.mxu1 %v1888_v1  ;;  %1376 = vmatprep.mubr.msk.bf16.mxu1 %vm1889_vm0, %v1888_v1  ;;  %v1561_v9 = vld [vmem:[%s2134_s25 + $0x18] sm:$0xff]   ;;  %v1562_v10 = vld [vmem:[%s2134_s25 + $0x10] sm:$0xff]   ;;  %v1563_v11 = vld [vmem:[%s2134_s25 + $0x8] sm:$0xff]   ;;  %s510_s0 = sadd.s32 1, %s1869_s12 }
  0x9c   : > { %s502_s23 = ssub.s32 0, %s501_s28  ;;  %1361 = vmatpush3.bf16.msra.mxu1 %v1557_v2  ;;  %v1564_v12 = vld [vmem:[%s2134_s25] sm:$0xff]   ;;  %v1565_v13 = vld [vmem:[%s2141_s21 + $0x38] sm:$0xff]   ;;  %v1566_v14 = vld [vmem:[%s2141_s21 + $0x30] sm:$0xff]   ;;  %s512_s22 = ssub.s32 0, %s510_s0 }
  0x9d   : > { %s2346_s23 = smov (!%p498_p2, %s502_s23), %s501_s28  ;;  %1362 = vmatprep.subr.bf16.mxu1 %v1888_v1  ;;  %v1567_v15 = vld [vmem:[%s2141_s21 + $0x28] sm:$0xff]   ;;  %v1568_v16 = vld [vmem:[%s2141_s21 + $0x20] sm:$0xff]   ;;  %v1569_v17 = vld [vmem:[%s2141_s21 + $0x18] sm:$0xff]   ;;  %s1265_s24 = smin.u32 %s512_s22, %s510_s0 }
  0x9e   : > { %p1264_p10 = scmp.lt.s32.totalorder %s2346_s23, 0  ;;  %s508_s20 = sadd.s32 2, %s2346_s23  ;;  %v1570_v18 = vld [vmem:[%s2141_s21 + $0x10] sm:$0xff]   ;;  %v1571_v24 = vld [vmem:[%s2141_s21 + $0x8] sm:$0xff]   ;;  %v1572_v25 = vld [vmem:[%s2141_s21] sm:$0xff]  }
  0x9f   : > { %v1573_v26 = vld [vmem:[#allocation11 + $0x38] sm:$0xff]   ;;  %v1574_v27 = vld [vmem:[#allocation11 + $0x30] sm:$0xff]   ;;  %v1575_v28 = vld [vmem:[#allocation11 + $0x28] sm:$0xff]   ;;  %s514_s1 = sand.u32 1, %s1265_s24   ;;  %p511_p9 = scmp.lt.s32.totalorder %s510_s0, 0 }
  0xa0   : > { %s2348_s20 = smov (!%p1264_p10, %s508_s20), %s2346_s23  ;;  %1363 = vmatpush3.bf16.msra.mxu1 %v1558_v3  ;;  %v1576_v29 = vld [vmem:[#allocation11 + $0x20] sm:$0xff]   ;;  %v1577_v30 = vld [vmem:[#allocation11 + $0x18] sm:$0xff]   ;;  %v1578_v39 = vld [vmem:[#allocation11 + $0x10] sm:$0xff]   ;;  %s515_s30 = ssub.s32 0, %s514_s1 }
  0xa1   : > { %1364 = vmatprep.subr.bf16.mxu1 %v1888_v1  ;;  %s1268_s27 = sshll.u32 %s2348_s20, 2  ;;  %v1270_v31 = vld [vmem:[%s2143_s2] ss:$0 sm:$0xff]  ;;  %v1579_v40 = vld [vmem:[#allocation11 + $0x8] sm:$0xff]   ;;  %v1580_v41 = vld [vmem:[#allocation11] sm:$0xff]   ;;  %s2350_s30 = smov (!%p511_p9, %s515_s30), %s514_s1 }
  0xa2   : > { %s529_s26 = scalar_lea.vmem [#allocation2], %s1268_s27  ;;  %v1581_v42 = vld [vmem:[#allocation12 + $0x38] sm:$0xff]   ;;  %v1582_v43 = vld [vmem:[#allocation12 + $0x30] sm:$0xff]   ;;  %v1583_v44 = vld [vmem:[#allocation12 + $0x28] sm:$0xff]   ;;  %p1267_p13 = scmp.lt.s32.totalorder %s2350_s30, 0 }
  0xa3   : > { %v530_v6 = vld [vmem:[%s529_s26] sm:$0xf]  ;;  %v1584_v45 = vld [vmem:[#allocation12 + $0x20] sm:$0xff]   ;;  %v1585_v46 = vld [vmem:[#allocation12 + $0x18] sm:$0xff]   ;;  %s521_s19 = sadd.s32 2, %s2350_s30  ;;  %s1310_s15 = sshll.u32 %s1869_s12, 7 }
  0xa4   : > { %1365 = vmatpush3.bf16.msra.mxu1 %v1559_v4  ;;  %v537_v8 = vsel %vm535_vm1, %v530_v6, 0  ;;  %v1586_v47 = vld [vmem:[#allocation12 + $0x10] sm:$0xff]   ;;  %v1279_v48 = vld [vmem:[%s2143_s2 + $0x1] ss:$0 sm:$0xff]  ;;  %v1288_v51 = vld [vmem:[%s2143_s2 + $0x2] ss:$0 sm:$0xff]  ;;  %s2352_s19 = smov (!%p1267_p13, %s521_s19), %s2350_s30  ;;  %s1070_s27 = scalar_lea.hbm %s2280_s9, %s1310_s15 }
  0xa5   : > { %1366 = vmatprep.subr.bf16.mxu1 %v1888_v1  ;;  %1355 = vmatpush3.bf16.msra.mxu0 %v537_v8  ;;  %v1289_v54 = vld [vmem:[%s2143_s2 + $0x3] ss:$0 sm:$0xff]  ;;  %s1290_s25 = sshll.u32 %s2352_s19, 2  ;;  %v1587_v61 = vld [vmem:[#allocation12 + $0x8] sm:$0xff]   ;;  %v1588_v62 = vld [vmem:[#allocation12] sm:$0xff]   ;;  %v1043_v8 = vlaneseq  ;;  %s1072_s28 = sshll.u32 %s2155_s14, 4  ;;  %s1073_s28 = int_to_ptr.vmem [resolvable:$true] %s1072_s28 }
  0xa6   : > { %1380 = vmatprep.subr.bf16.mxu0 %v1888_v1  ;;  %s817_s16 = scalar_lea.vmem [#allocation2], %s1290_s25  ;;  %v1291_v63 = vld [vmem:[%s2277_s6] ss:$0 sm:$0xff]  ;;  %s1058_s26 = scalar_lea.sflag [#allocation5], %s2131_s3 }
  0xa7   : > { %s1781_s0 = scalar_lea.vmem %s1073_s28, 128  ;;  %s1890_s22 = smov [#allocation14]  }
  0xa8   : > { %1367 = vmatpush3.bf16.msra.mxu1 %v1560_v5  ;;  %1357 = vmatmul.mubr.msk.bf16.vlgmr.msra.gmra.mxu0 %vm531_vm2, %v527_v7  ;;  %p1782_p0 = scmp.ne.s32.totalorder %s1073_s28, %s1781_s0  ;;  %s1785_s24 = sshll.u32 %s1890_s22, 4  ;;  %s1786_s24 = int_to_ptr.vmem [resolvable:$false] %s1785_s24 }
  0xa9   : > { %1368 = vmatprep.subr.bf16.mxu1 %v1888_v1  ;;  %1396 = vmatprep.mubr.msk.bf16.mxu0 %vm1889_vm0, %v1888_v1  ;;  %s1787_s1 = scalar_lea.vmem %s1786_s24, 256  ;;  %p1788_p12 = scmp.lt.s32.totalorder %s1073_s28, %s1786_s24 }
  0xaa   : > { %1381 = vmatpush3.bf16.msra.mxu0 %v1565_v13  ;;  %p1783_p3 = pnand %p1782_p0, %p2024_p7  ;;  %p1789_p8 = scmp.lt.s32.totalorder %s1787_s1, %s1781_s0 }
  0xab   : > { %1382 = vmatprep.subr.bf16.mxu0 %v1888_v1 }
  0xac   : > { %1369 = vmatpush3.bf16.msra.mxu1 %v1561_v9  ;;  %v1044_v9 = vand.u32 127, %v1043_v8  ;;  %p1784_p1 = pneg %p1783_p3  ;;  %p1790_p11 = por %p1789_p8, %p1788_p12 }
  0xad   : > { %1370 = vmatprep.subr.bf16.mxu1 %v1888_v1 }
  0xae   : > { %1383 = vmatpush3.bf16.msra.mxu0 %v1566_v14  ;;  %vm1045_vm3 = vcmp.lt.s32.totalorder %v1044_v9, 3  ;;  %p1791_p5 = pnand %p1790_p11, %p1784_p1 }
  0xaf   : > { %1384 = vmatprep.subr.bf16.mxu0 %v1888_v1 }
  0xb0   : > { %1371 = vmatpush3.bf16.msra.mxu1 %v1562_v10 }
  0xb1   : > { %1372 = vmatprep.subr.bf16.mxu1 %v1888_v1 }
  0xb2   : > { %1385 = vmatpush3.bf16.msra.mxu0 %v1567_v15 }
  0xb3   : > { %1386 = vmatprep.subr.bf16.mxu0 %v1888_v1 }
  0xb4   : > { %1373 = vmatpush3.bf16.msra.mxu1 %v1563_v11 }
  0xb5   : > { %1374 = vmatprep.subr.bf16.mxu1 %v1888_v1 }
  0xb6   : > { %1387 = vmatpush3.bf16.msra.mxu0 %v1568_v16 }
  0xb7   : > { %1388 = vmatprep.subr.bf16.mxu0 %v1888_v1 }
  0xb8   : > { %1375 = vmatpush3.bf16.msra.mxu1 %v1564_v12 }
  0xb9   : > { %1400 = vmatprep.subr.bf16.mxu1 %v1888_v1 }
  0xba   : > { %1389 = vmatpush3.bf16.msra.mxu0 %v1569_v17 }
  0xbb   : > { %1390 = vmatprep.subr.bf16.mxu0 %v1888_v1 }
  0xbe   : > { %1391 = vmatpush3.bf16.msra.mxu0 %v1570_v18 }
  0xbf   : > { %1392 = vmatprep.subr.bf16.mxu0 %v1888_v1 }
  0xc2   : > { %1393 = vmatpush3.bf16.msra.mxu0 %v1571_v24 }
  0xc3   : > { %1394 = vmatprep.subr.bf16.mxu0 %v1888_v1 }
  0xc6   : > { %1395 = vmatpush3.bf16.msra.mxu0 %v1572_v25 }
  0xc7   : > { %1420 = vmatprep.subr.bf16.mxu0 %v1888_v1 }
 0x168   : > { %v573_v19 = vpop.f32.mrf.mxu0 }
 0x169   : > { %v583_v20 = vpack.c.bf16 %v573_v19, %v573_v19 }
 0x16a   : > { %v1358_v21 = vpop.f32.mrf.mxu0 }
 0x16b   : > { %1377 = vmatmul.mubr.bf16.vlgmr.msra.gmra.mxu1 %v583_v20 }
 0x16c   : > { %v576_v22 = vpop.f32.mrf.mxu0  ;;  %1416 = vmatprep.mubr.msk.bf16.mxu1 %vm1889_vm0, %v1888_v1  ;;  %1401 = vmatpush3.bf16.msra.mxu1 %v1573_v26 }
 0x16d   : > { %1402 = vmatprep.subr.bf16.mxu1 %v1888_v1 }
 0x16e   : > { %v1359_v23 = vpop.f32.mrf.mxu0 }
 0x170   : > { %1403 = vmatpush3.bf16.msra.mxu1 %v1574_v27 }
 0x171   : > { %1404 = vmatprep.subr.bf16.mxu1 %v1888_v1 }
 0x174   : > { %1405 = vmatpush3.bf16.msra.mxu1 %v1575_v28 }
 0x175   : > { %1406 = vmatprep.subr.bf16.mxu1 %v1888_v1 }
 0x178   : > { %1407 = vmatpush3.bf16.msra.mxu1 %v1576_v29 }
 0x179   : > { %1408 = vmatprep.subr.bf16.mxu1 %v1888_v1 }
 0x17c   : > { %1409 = vmatpush3.bf16.msra.mxu1 %v1577_v30 }
 0x17d   : > { %1410 = vmatprep.subr.bf16.mxu1 %v1888_v1 }
 0x180   : > { %1411 = vmatpush3.bf16.msra.mxu1 %v1578_v39 }
 0x181   : > { %1412 = vmatprep.subr.bf16.mxu1 %v1888_v1 }
 0x184   : > { %1413 = vmatpush3.bf16.msra.mxu1 %v1579_v40 }
 0x185   : > { %1414 = vmatprep.subr.bf16.mxu1 %v1888_v1 }
 0x188   : > { %1415 = vmatpush3.bf16.msra.mxu1 %v1580_v41 }
 0x22b   : > { %v686_v32 = vpop.f32.mrf.mxu1 }
 0x22c   : > { %v687_v33 = vadd.f32 %v1270_v31, %v686_v32 }
 0x22d   : > { %v1378_v34 = vpop.f32.mrf.mxu1 }
 0x22e   : > { %v692_v35 = vmax.f32 %v687_v33, 0.0 }
 0x22f   : > { %v689_v36 = vpop.f32.mrf.mxu1 }
 0x230   : > { %v693_v37 = vpack.c.bf16 %v692_v35, %v692_v35 }
 0x231   : > { %v1379_v38 = vpop.f32.mrf.mxu1 }
 0x232   : > { %1397 = vmatmul.mubr.bf16.vlgmr.msra.gmra.mxu0 %v693_v37 }
 0x233   : > { %1436 = vmatprep.mubr.msk.bf16.mxu0 %vm1889_vm0, %v1888_v1  ;;  %1421 = vmatpush3.bf16.msra.mxu0 %v1581_v42 }
 0x234   : > { %1422 = vmatprep.subr.bf16.mxu0 %v1888_v1 }
 0x237   : > { %1423 = vmatpush3.bf16.msra.mxu0 %v1582_v43 }
 0x238   : > { %1424 = vmatprep.subr.bf16.mxu0 %v1888_v1 }
 0x23b   : > { %1425 = vmatpush3.bf16.msra.mxu0 %v1583_v44 }
 0x23c   : > { %1426 = vmatprep.subr.bf16.mxu0 %v1888_v1 }
 0x23f   : > { %1427 = vmatpush3.bf16.msra.mxu0 %v1584_v45 }
 0x240   : > { %1428 = vmatprep.subr.bf16.mxu0 %v1888_v1 }
 0x243   : > { %1429 = vmatpush3.bf16.msra.mxu0 %v1585_v46 }
 0x244   : > { %1430 = vmatprep.subr.bf16.mxu0 %v1888_v1 }
 0x247   : > { %1431 = vmatpush3.bf16.msra.mxu0 %v1586_v47 }
 0x248   : > { %1432 = vmatprep.subr.bf16.mxu0 %v1888_v1 }
 0x24b   : > { %1433 = vmatpush3.bf16.msra.mxu0 %v1587_v61 }
 0x24c   : > { %1434 = vmatprep.subr.bf16.mxu0 %v1888_v1  ;;  %v1300_v1 = vld [vmem:[%s2279_s8] ss:$0 sm:$0xff] }
 0x24f   : > { %1435 = vmatpush3.bf16.msra.mxu0 %v1588_v62 }
 0x2f2   : > { %v796_v49 = vpop.f32.mrf.mxu0 }
 0x2f3   : > { %v797_v50 = vadd.f32 %v1279_v48, %v796_v49 }
 0x2f4   : > { %v1398_v52 = vpop.f32.mrf.mxu0 }
 0x2f5   : > { %v802_v53 = vmax.f32 %v797_v50, 0.0 }
 0x2f6   : > { %v799_v55 = vpop.f32.mrf.mxu0 }
 0x2f7   : > { %v807_v56 = vmul.f32 %v1288_v51, %v802_v53 }
 0x2f8   : > { %v1399_v57 = vpop.f32.mrf.mxu0 }
 0x2f9   : > { %v812_v58 = vadd.f32 %v1289_v54, %v807_v56 }
 0x2fb   : > { %v813_v59 = vmax.f32 %v812_v58, 0.0 }
 0x2fd   : > { %v814_v60 = vpack.c.bf16 %v813_v59, %v813_v59 }
 0x2ff   : > { %818 = vst [vmem:[%s817_s16] sm:$0xf] %v814_v60  ;;  %1417 = vmatmul.mubr.bf16.vlgmr.msra.gmra.mxu1 %v814_v60 }
 0x3bf   : > { %v924_v0 = vpop.f32.mrf.mxu1 }
 0x3c0   : > { %v925_v2 = vadd.f32 %v1291_v63, %v924_v0 }
 0x3c1   : > { %v1418_v3 = vpop.f32.mrf.mxu1 }
 0x3c2   : > { %v930_v4 = vmax.f32 %v925_v2, 0.0 }
 0x3c3   : > { %v927_v5 = vpop.f32.mrf.mxu1 }
 0x3c4   : > { %v931_v6 = vpack.c.bf16 %v930_v4, %v930_v4 }
 0x3c5   : > { %v1419_v7 = vpop.f32.mrf.mxu1 }
 0x3c6   : > { %1437 = vmatmul.mubr.bf16.vlgmr.msra.gmra.mxu0 %v931_v6 }
 0x486   : > { %v1037_v10 = vpop.f32.mrf.mxu0 }
 0x487   : > { %v1038_v11 = vadd.f32 %v1300_v1, %v1037_v10 }
 0x488   : > { %v1438_v12 = vpop.f32.mrf.mxu0 }
 0x489   : > { %v1046_v13 = vsel %vm1045_vm3, %v1038_v11, -1e+30 }
 0x48a   : > { %1047 = vmax.xlane.f32.xlu0 %v1046_v13  ;;  %v1040_v14 = vpop.f32.mrf.mxu0 }
 0x48c   : > { %v1439_v15 = vpop.f32.mrf.mxu0 }
 0x513   : > { %v1048_v16 = vpop.xlane.xlu0 %1047 }
 0x514   : > { %v1049_v17 = vsub.f32 %v1046_v13, %v1048_v16 }
 0x516   : > { %v1050_v18 = vmul.f32 1.442695, %v1049_v17 }
 0x518   : > { %1589 = vpow2.f32 %v1050_v18 }
 0x525   : > { %v1590_v19 = vpop.eup %1589 }
 0x526   : > { %1052 = vadd.xlane.f32.xlu0 %v1590_v19 }
 0x5af   : > { %v1053_v20 = vpop.xlane.xlu0 %1052 }
 0x5b0   : > { %1591 = vrcp.f32 %v1053_v20 }
 0x5bd   : > { %v1592_v21 = vpop.eup %1591 }
 0x5be   : > { %v1055_v22 = vmul.f32 %v1592_v21, %v1590_v19 }
 0x5c0   : > { %1056 = vst [vmem:[%s2155_s14] sm:$0xff] %v1055_v22 }
 0x5c1   : > { %1794 = shalt.err (!%p1791_p5)
}
 0x5c2   : > { %s1795_s12 = scalar_lea.hbm %s1070_s27, 128  ;;  %s1799_s30 = scalar_lea.hbm %s2280_s9, 384 }
 0x5c3   : > { %p1796_p6 = scmp.ne.s32.totalorder %s1070_s27, %s1795_s12  ;;  %p1800_p10 = scmp.lt.s32.totalorder %s1070_s27, %s2280_s9 }
 0x5c4   : > { %p1801_p9 = scmp.lt.s32.totalorder %s1799_s30, %s1795_s12 }
 0x5c5   : > { %p1797_p4 = pnand %p1796_p6, %p2024_p7 }
 0x5c6   : > { %p1802_p13 = por %p1801_p9, %p1800_p10 }
 0x5c7   : > { %p1798_p2 = pneg %p1797_p4 }
 0x5c9   : > { %p1803_p0 = pnand %p1802_p13, %p1798_p2 }
 0x5cb   : > { %1806 = shalt.err (!%p1803_p0)
}
 0x5cc   : > { %1462 = dma.vmem_to_hbm [thread:$0]  (%p2024_p7), %s1073_s28, 128, %s1070_s27, %s1058_s26  }
 0x5cd PF: > { %s2332_s16 = sld [smem:[#allocation22_spill]] }
 0x5ce   : > { %s2333_s21 = sld [smem:[#allocation21_spill]] }
 0x5cf   : > { %s2334_s17 = sld [smem:[#allocation23_spill]] }
 0x5d3   : > { %p1500_p3 = scmp.ge.s32.totalorder %s2332_s16, 2 }
 0x5d4   : > { %s1084_s2 = sand.u32 1, %s2333_s21  }
 0x5d5   : > { %p2335_p1 = scmp.ne.s32.totalorder %s2334_s17, 0  ;;  %s1085_s18 = scalar_lea.sflag [#allocation5], %s1084_s2 }
 0x5d7   : > { %p1488_p12 = pnand %p1500_p3, %p2335_p1 }
 0x5d9   : > { %p1489_p8 = pneg %p1488_p12 }
 0x5db   : > { %1852 = dma.done.wait (%p1489_p8), %s1085_s18, 128  }
 0x5dc   : > { %1854 = vsyncadd (%p1489_p8), %s1085_s18, 4294967168  ;;  %s25_s14 = sadd.s32 1, %s2332_s16   ;;  %s2336_s15 = sld [smem:[#allocation25_spill]] }
 0x5dd   : > { %p22_p11 = scmp.ge.s32.totalorder %s25_s14, 5   ;;  %s2337_s29 = sld [smem:[#allocation24_spill]] }
 0x5de   : > { %s2338_s30 = smov %s1861_s10  ;;  %s2339_s10 = smov %s1865_s11 }
 0x5df   : > { %s2341_s12 = smov %s1873_s13  ;;  %24 = sbr.rel (!%p22_p11) target bundleno = 12 (0xc), region = 145 }
 0x5e2   : > { %s2340_s11 = smov %s2336_s15 }
 0x5e3   : > { %s2342_s13 = smov %s2337_s29 }
 0x5e4   :  { %1090 = vsyncpa [#allocation4], 1 }
 0x5e5   :  { %1092 = vsyncpa [#allocation4 + $0x1], 1 }
 0x5e6   :  { %1093 = vsyncpa [#allocation7], 1 }
 0x5e7   :  { %1094 = vsyncpa [#allocation13], 1 }
 0x5e8   :  { %1095 = vsyncpa [#allocation5], 1 }
 0x5e9   :  { %1097 = vsyncpa [#allocation5 + $0x1], 1 }

</bundles_post_ra>
